<compile_context>
chip_gen: v6e
topology: v6e:2x2x1
jax: 0.10.0
libtpu: 0.0.40
codegen_flags: <defaults>
</compile_context>

<pallas_src>
import functools

import jax
import jax.numpy as jnp
from jax.experimental import pallas as pl
from jax.experimental.pallas import tpu as pltpu

LANE = 128
MAX_BLOCK_ROWS = 2048          # 2048 * 128 * 4 B = 1 MiB per f32 tile
POWER = 0.1                    # deterministic "parameter" of the module


def _round_up(a, b):
    return ((a + b - 1) // b) * b


# ---------------------------------------------------------------------------
# Kernel 1: base_p = sum(|x|) * (power / n)   (VMEM tile accumulator)
# ---------------------------------------------------------------------------
def _abs_mean_kernel(x_ref, bp_ref, acc_ref, *, scale):
    @pl.when(pl.program_id(0) == 0)
    def _init():
        acc_ref[...] = jnp.zeros_like(acc_ref)

    # elementwise accumulate (VPU only); cross-lane reduce deferred to last step
    acc_ref[...] += jnp.abs(x_ref[...].astype(jnp.float32))

    @pl.when(pl.program_id(0) == pl.num_programs(0) - 1)
    def _finalize():
        bp_ref[0, 0] = jnp.sum(acc_ref[...]) * scale


# ---------------------------------------------------------------------------
# Kernel 2: y = x + noise * base_p   (f32 math, output in original dtype)
# ---------------------------------------------------------------------------
def _add_noise_kernel(bp_ref, x_ref, noise_ref, o_ref):
    bp = bp_ref[0, 0]
    y = x_ref[...].astype(jnp.float32) + noise_ref[...].astype(jnp.float32) * bp
    o_ref[...] = y.astype(o_ref.dtype)


# ---------------------------------------------------------------------------
# Wrapper
# ---------------------------------------------------------------------------
def gaus_noiser(x, *, power=POWER, seed=0, key=None, training=True, mask=None):
    if not training:
        return x
    if mask is not None:
        # TODO(synk): masked base_p path not supported in this Pallas port.
        raise NotImplementedError("mask is not supported in this Pallas port")

    orig_shape = x.shape
    orig_dtype = x.dtype
    n = x.size

    rows = -(-n // LANE)                                   # ceil(n / 128)
    block_rows = min(MAX_BLOCK_ROWS, _round_up(rows, 8))
    padded_rows = _round_up(rows, block_rows)
    padded_n = padded_rows * LANE
    grid = (padded_rows // block_rows,)

    flat = x.reshape(-1)
    if padded_n != n:                                      # pad only when needed
        flat = jnp.pad(flat, (0, padded_n - n))
    x2d = flat.reshape(padded_rows, LANE)                  # stays in orig dtype

    # ---- pass 1: base_p = mean(|x|) * power (padded zeros don't contribute) --
    base_p = pl.pallas_call(
        functools.partial(_abs_mean_kernel, scale=float(power) / float(n)),
        out_shape=jax.ShapeDtypeStruct((1, 1), jnp.float32),
        grid_spec=pltpu.PrefetchScalarGridSpec(
            num_scalar_prefetch=0,
            grid=grid,
            in_specs=[pl.BlockSpec((block_rows, LANE), lambda i: (i, 0))],
            out_specs=pl.BlockSpec((1, 1), lambda i: (0, 0),
                                   memory_space=pltpu.MemorySpace.SMEM),
            scratch_shapes=[pltpu.VMEM((block_rows, LANE), jnp.float32)],
        ),
        compiler_params=pltpu.CompilerParams(
            dimension_semantics=("arbitrary",)),
    )(x2d)

    # ---- standard-normal noise (tiling-invariant, generated once) -----------
    if key is None:
        key = jax.random.PRNGKey(seed)
    noise_dtype = (orig_dtype if jnp.issubdtype(orig_dtype, jnp.floating)
                   else jnp.float32)
    noise2d = jax.random.normal(key, (padded_rows, LANE), dtype=noise_dtype)

    # ---- pass 2: y = x + noise * base_p --------------------------------------
    y2d = pl.pallas_call(
        _add_noise_kernel,
        out_shape=jax.ShapeDtypeStruct((padded_rows, LANE), orig_dtype),
        grid_spec=pltpu.PrefetchScalarGridSpec(
            num_scalar_prefetch=0,
            grid=grid,
            in_specs=[
                pl.BlockSpec(memory_space=pltpu.MemorySpace.SMEM),      # base_p (1,1)
                pl.BlockSpec((block_rows, LANE), lambda i: (i, 0)),     # x tile
                pl.BlockSpec((block_rows, LANE), lambda i: (i, 0)),     # noise tile
            ],
            out_specs=pl.BlockSpec((block_rows, LANE), lambda i: (i, 0)),
        ),
        compiler_params=pltpu.CompilerParams(
            dimension_semantics=("parallel",)),
    )(base_p, x2d, noise2d)

    if padded_n == n:
        return y2d.reshape(orig_shape)
    return y2d.reshape(-1)[:n].reshape(orig_shape)


if __name__ == "__main__":
    key = jax.random.PRNGKey(0)
    x = jax.random.normal(key, (2, 4, 16, 16), dtype=jnp.float32)   # NCHW activations

    seed = 123
    y = gaus_noiser(x, power=POWER, seed=seed, training=True)
    y = jax.block_until_ready(y)

    # sanity checks
    assert y.shape == x.shape and y.dtype == x.dtype
    assert bool(jnp.all(jnp.isfinite(y)))

    # exact reference: noise is reproducible from the seed + (rows, 128) slab
    rows = x.size // LANE
    noise_ref = jax.random.normal(jax.random.PRNGKey(seed), (rows, LANE),
                                  dtype=jnp.float32).reshape(x.shape)
    base_p_ref = jnp.mean(jnp.abs(x)) * POWER
    y_ref = x + noise_ref * base_p_ref
    assert bool(jnp.allclose(y, y_ref, rtol=1e-5, atol=1e-5))

    # eval path is identity
    y_eval = jax.block_until_ready(gaus_noiser(x, training=False))
    assert bool(jnp.all(y_eval == x))

    print("KERNEL_OK")
</pallas_src>

<mosaic_0001>
module attributes {stable_mosaic.version = 11 : i64} {
  func.func @_abs_mean_kernel(%arg0: i32, %arg1: memref<16x128xf32, #tpu.memory_space<vmem>>, %arg2: memref<1x1xf32, #tpu.memory_space<smem>>, %arg3: memref<16x128xf32, #tpu.memory_space<vmem>>) attributes {dimension_semantics = [#tpu.dimension_semantics<arbitrary>], iteration_bounds = array<i64: 1>, scalar_prefetch = 0 : i64, scratch_operands = 1 : i64, tpu.core_type = #tpu.core_type<tc>, window_params = [{transform_indices = @transform_0, window_bounds = array<i64: 16, 128>}, {transform_indices = @transform_1, window_bounds = array<i64: 1, 1>}]} {
    %c0_i32 = arith.constant 0 : i32
    %0 = arith.cmpi eq, %arg0, %c0_i32 : i32
    %1 = arith.extui %0 : i1 to i32
    %c0_i32_0 = arith.constant 0 : i32
    %2 = arith.cmpi ne, %1, %c0_i32_0 : i32
    scf.if %2 {
      %cst = arith.constant 0.000000e+00 : f32
      %11 = vector.broadcast %cst : f32 to vector<16x128xf32>
      %c0_8 = arith.constant 0 : index
      %c0_9 = arith.constant 0 : index
      %12 = vector.load %arg3[%c0_8, %c0_9] : memref<16x128xf32, #tpu.memory_space<vmem>>, vector<16x128xf32>
      tpu.vector_store %arg3[%c0_8, %c0_9], %11 {strides = array<i32>} : memref<16x128xf32, #tpu.memory_space<vmem>>, vector<16x128xf32>,
    } else {
    }
    %c0 = arith.constant 0 : index
    %c0_1 = arith.constant 0 : index
    %3 = vector.load %arg3[%c0, %c0_1] : memref<16x128xf32, #tpu.memory_space<vmem>>, vector<16x128xf32>
    %c0_2 = arith.constant 0 : index
    %c0_3 = arith.constant 0 : index
    %4 = vector.load %arg1[%c0_2, %c0_3] : memref<16x128xf32, #tpu.memory_space<vmem>>, vector<16x128xf32>
    %5 = math.absf %4 : vector<16x128xf32>
    %6 = arith.addf %3, %5 : vector<16x128xf32>
    %c0_4 = arith.constant 0 : index
    %c0_5 = arith.constant 0 : index
    %7 = vector.load %arg3[%c0_4, %c0_5] : memref<16x128xf32, #tpu.memory_space<vmem>>, vector<16x128xf32>
    tpu.vector_store %arg3[%c0_4, %c0_5], %6 {strides = array<i32>} : memref<16x128xf32, #tpu.memory_space<vmem>>, vector<16x128xf32>,
    %c0_i32_6 = arith.constant 0 : i32
    %8 = arith.cmpi eq, %arg0, %c0_i32_6 : i32
    %9 = arith.extui %8 : i1 to i32
    %c0_i32_7 = arith.constant 0 : i32
    %10 = arith.cmpi ne, %9, %c0_i32_7 : i32
    scf.if %10 {
      %c0_8 = arith.constant 0 : index
      %c0_9 = arith.constant 0 : index
      %11 = vector.load %arg3[%c0_8, %c0_9] : memref<16x128xf32, #tpu.memory_space<vmem>>, vector<16x128xf32>
      %12 = vector.shape_cast %11 : vector<16x128xf32> to vector<1x16x128xf32>
      %cst = arith.constant dense<0.000000e+00> : vector<1xf32>
      %13 = vector.multi_reduction <add>, %12, %cst [1, 2] : vector<1x16x128xf32> to vector<1xf32>
      %14 = vector.shape_cast %13 : vector<1xf32> to vector<1x1x1xf32>
      %15 = vector.extract %14[0, 0, 0] : f32 from vector<1x1x1xf32>
      %cst_10 = arith.constant 4.88281257E-5 : f32
      %16 = arith.mulf %15, %cst_10 : f32
      %c0_11 = arith.constant 0 : index
      %c0_12 = arith.constant 0 : index
      %17 = memref.load %arg2[%c0_11, %c0_12] : memref<1x1xf32, #tpu.memory_space<smem>>
      memref.store %16, %arg2[%c0_11, %c0_12] : memref<1x1xf32, #tpu.memory_space<smem>>
    } else {
    }
    return
  }
  func.func @transform_0(%arg0: i32) -> (i32, i32) {
    %c0_i32 = arith.constant 0 : i32
    %c0_i32_0 = arith.constant 0 : i32
    return %arg0, %c0_i32 : i32, i32
  }
  func.func @transform_1(%arg0: i32) -> (i32, i32) {
    %c0_i32 = arith.constant 0 : i32
    %c0_i32_0 = arith.constant 0 : i32
    %c0_i32_1 = arith.constant 0 : i32
    return %c0_i32, %c0_i32_0 : i32, i32
  }
}

</mosaic_0001>

<bundles_post_ra>
// kernel: tpu_custom_call.1
= control target key start
LH: loop header
LB: loop body
LE: loop exit
PB: predicated region body
PF: predicated region fallthrough
CT: control target
= control target key end

     0   :  { %6 = vsyncpa [#allocation4], 0  ;;  %s129_s0 = inlined_call_operand.hbm [shape: f32[16,128], index: 0, kind: input, shape index: {}]   ;;  %s130_s1 = inlined_call_operand.hbm [shape: f32[1,1], index: 1, kind: output, shape index: {}]  }
   0x1   :  { %7 = vsyncpa [#allocation5], 0  ;;  %s109_s6 = smov [#allocation3]  }
   0x2   :  { %s13_s7 = sshll.u32 %s109_s6, 4  ;;  %s14_s7 = int_to_ptr.vmem [resolvable:$true] %s13_s7 }
   0x3   :  { %s85_s8 = scalar_lea.vmem %s14_s7, 256  ;;  %p90_p1 = scmp.lt.s32.totalorder %s14_s7, %s14_s7 }
   0x4   :  { %p86_p0 = scmp.ne.s32.totalorder %s14_s7, %s85_s8  ;;  %p91_p2 = scmp.lt.s32.totalorder %s85_s8, %s85_s8 }
   0x6   :  { %p92_p3 = por %p91_p2, %p90_p1 }
   0x8   :  { %p93_p4 = pnand %p92_p3, %p86_p0 }
   0xa   :  { %96 = shalt.err (!%p93_p4)
}
   0xb   :  { %s110_s9 = smov 128   ;;  %s111_s10 = smov 8  }
   0xc   :  { %19 = dma.hbm_to_vmem [thread:$0]  %s129_s0, 256, %s14_s7, [#allocation4], %s110_s9, %s110_s9, %s111_s10  }
   0xd   :  { %105 = dma.done.wait [#allocation4], 256  }
   0xe   :  { %106 = vsyncadd [#allocation4], 4294967040  ;;  %v31_v0 = vld [vmem:[#allocation3] sm:$0xff]  ;;  %v32_v1 = vld [vmem:[#allocation3 + $0x8] sm:$0xff]  ;;  %s112_s0 = smov [#allocation6]  }
   0xf   :  { %v33_v2 = vand.u32 2147483647, %v31_v0  ;;  %v34_v3 = vand.u32 2147483647, %v32_v1 }
  0x11   :  { %v44_v4 = vadd.f32 %v34_v3, %v33_v2 }
  0x13   :  { %45 = vadd.xlane.f32.xlu0 %v44_v4 }
  0x9c   :  { %v46_v5 = vpop.xlane.xlu0 %45 }
  0x9d   :  { %v47_v6 = vrot.slane %v46_v5, 4 }
  0x9f   :  { %v48_v7 = vadd.f32 %v47_v6, %v46_v5 }
  0xa1   :  { %v49_v8 = vrot.slane %v48_v7, 2 }
  0xa3   :  { %v50_v9 = vadd.f32 %v49_v8, %v48_v7 }
  0xa5   :  { %v51_v10 = vrot.slane %v50_v9, 1 }
  0xa7   :  { %v52_v11 = vadd.f32 %v51_v10, %v50_v9 }
  0xa9   :  { %71 = vpush %v52_v11 }
  0xda   :  { %s72_s13 = spop %71 }
  0xdb   :  { %s54_s14 = smul.f32 4.8828126e-05, %s72_s13 }
  0xdd   :  { %56 = sst [smem:[#allocation6]] %s54_s14 }
  0xde   :  { %64 = dma.smem_to_hbm %s112_s0, 16, %s130_s1, [#allocation5]  }
  0xdf   :  { %107 = dma.done.wait [#allocation5], 16  }
  0xe0   :  { %108 = vsyncadd [#allocation5], 4294967280 }
  0xe1   :  { %68 = sfence }
  0xe2   :  { %69 = vsyncpa [#allocation4], 1 }
  0xe3   :  { %70 = vsyncpa [#allocation5], 1 }

</bundles_post_ra>
